<compile_context>
chip_gen: v7x
topology: tpu7x:2x2x1
jax: 0.10.0
libtpu: 0.0.40
codegen_flags: <defaults>
</compile_context>

<pallas_src>
import functools

import jax
import jax.numpy as jnp
from jax.experimental import pallas as pl
from jax.experimental.pallas import tpu as pltpu


# Budget for the pipelined VMEM blocks (2x input + 2x output + f32 acc temps).
# Conservative enough to fit every generation's scoped VMEM default (v5e 16 MiB).
_VMEM_BLOCK_BUDGET_BYTES = 16 * 1024 * 1024
_MAX_INPUT_BLOCK_BYTES = 8 * 1024 * 1024     # DMA efficiency plateau; bigger buys nothing
_VMEM_LIMIT_BYTES = 32 * 1024 * 1024


def _mean_agg_kernel(m_ref, c_ref, *, k, d):
    # m_ref: (TN, K*D) tile in VMEM ; c_ref: (TN, D) tile.
    # Lane-aligned D-wide slices summed with a pairwise add tree: pure VPU,
    # f32 accumulation, no whole-block f32 materialization, no XLU reduce.
    # TODO(synk): for very large K (e.g. sampled degree 128+) switch the tree to
    #             lax.fori_loop(..., unroll=True) to bound code size.
    parts = [m_ref[:, pl.ds(i * d, d)].astype(jnp.float32) for i in range(k)]
    while len(parts) > 1:
        nxt = [parts[j] + parts[j + 1] for j in range(0, len(parts) - 1, 2)]
        if len(parts) % 2:
            nxt.append(parts[-1])
        parts = nxt
    c_ref[...] = (parts[0] * (1.0 / k)).astype(c_ref.dtype)


def _choose_tiling(n, k, d, itemsize):
    # Packed-sublane height: 8 rows for 4-byte, 16 for 2-byte, 32 for 1-byte.
    align = max(8, 32 // itemsize)

    # Bytes per node row held in VMEM at once:
    #   2x (double-buffered) input slab + 2x output slab + f32 acc temporaries.
    per_row_bytes = 2 * (k * d + d) * itemsize + 2 * d * 4
    tile_n = _VMEM_BLOCK_BUDGET_BYTES // per_row_bytes

    # Byte cap on the input block (DMA plateau) instead of a fixed row cap.
    tile_n = min(tile_n, _MAX_INPUT_BLOCK_BYTES // (k * d * itemsize))

    tile_n = max(align, (tile_n // align) * align)

    # Don't over-size tiny inputs (keeps the single ragged block small).
    n_aligned = ((n + align - 1) // align) * align
    tile_n = min(tile_n, n_aligned)

    num_tiles = pl.cdiv(n, tile_n)
    if num_tiles > 1:
        # Rebalance across 2 TensorCores (v7x): even number of balanced tiles.
        num_tiles = ((num_tiles + 1) // 2) * 2
        tile_n = pl.cdiv(n, num_tiles)
        tile_n = ((tile_n + align - 1) // align) * align
        num_tiles = pl.cdiv(n, tile_n)

    return tile_n, num_tiles


def aggregator_mean(mailbox):
    """Pallas mean aggregation over neighbours.

    mailbox: [N, K, D]  ->  returns c: [N, D]
    """
    N, K, D = mailbox.shape
    itemsize = jnp.dtype(mailbox.dtype).itemsize

    tile_n, num_tiles = _choose_tiling(N, K, D, itemsize)

    # Row-major reshape to a lane-dense 2-D slab [N, K*D] (free, no copy).
    m2 = mailbox.reshape(N, K * D)

    kernel = functools.partial(_mean_agg_kernel, k=K, d=D)

    # Accurate, bandwidth-dominant estimate: (K-1) adds + 1 mul per output elem.
    cost = pl.CostEstimate(
        flops=N * K * D,
        transcendentals=0,
        bytes_accessed=N * K * D * itemsize + N * D * itemsize,
    )

    out = pl.pallas_call(
        kernel,
        out_shape=jax.ShapeDtypeStruct((N, D), mailbox.dtype),
        grid_spec=pltpu.PrefetchScalarGridSpec(
            num_scalar_prefetch=0,
            grid=(num_tiles,),
            in_specs=[
                pl.BlockSpec((tile_n, K * D), lambda i: (i, 0)),
            ],
            out_specs=pl.BlockSpec((tile_n, D), lambda i: (i, 0)),
        ),
        compiler_params=pltpu.CompilerParams(
            dimension_semantics=("parallel",),
            vmem_limit_bytes=_VMEM_LIMIT_BYTES,
        ),
        cost_estimate=cost,
    )(m2)

    return out


if __name__ == "__main__":
    key = jax.random.PRNGKey(0)

    # Test 1: small, sublane-aligned shapes — 16 nodes, 8 neighbours, 128 dims.
    N, K, D = 16, 8, 128
    mailbox = jax.random.normal(key, (N, K, D), dtype=jnp.float32)
    c = jax.block_until_ready(aggregator_mean(mailbox))
    ref = jnp.mean(mailbox, axis=1)
    assert c.shape == (N, D)
    assert jnp.allclose(c, ref, atol=1e-5, rtol=1e-5)

    # Test 2: ragged node count (exercises Pallas's automatic last-tile clipping,
    # which replaces the old wrapper-side pad + slice).
    N2 = 50
    mailbox2 = jax.random.normal(jax.random.PRNGKey(1), (N2, K, D), dtype=jnp.float32)
    c2 = jax.block_until_ready(aggregator_mean(mailbox2))
    ref2 = jnp.mean(mailbox2, axis=1)
    assert c2.shape == (N2, D)
    assert jnp.allclose(c2, ref2, atol=1e-5, rtol=1e-5)

    print("KERNEL_OK")
</pallas_src>

<mosaic_0001>
module attributes {stable_mosaic.version = 11 : i64} {
  func.func @_mean_agg_kernel(%arg0: i32, %arg1: memref<16x1024xf32, #tpu.memory_space<vmem>>, %arg2: memref<16x128xf32, #tpu.memory_space<vmem>>) attributes {dimension_semantics = [#tpu.dimension_semantics<parallel>], iteration_bounds = array<i64: 1>, scalar_prefetch = 0 : i64, scratch_operands = 0 : i64, tpu.core_type = #tpu.core_type<tc>, window_params = [{transform_indices = @transform_0, window_bounds = array<i64: 16, 1024>}, {transform_indices = @transform_1, window_bounds = array<i64: 16, 128>}]} {
    %c0 = arith.constant 0 : index
    %c0_0 = arith.constant 0 : index
    %0 = vector.load %arg1[%c0, %c0_0] : memref<16x1024xf32, #tpu.memory_space<vmem>>, vector<16x128xf32>
    %c0_1 = arith.constant 0 : index
    %c128 = arith.constant 128 : index
    %1 = vector.load %arg1[%c0_1, %c128] : memref<16x1024xf32, #tpu.memory_space<vmem>>, vector<16x128xf32>
    %c0_2 = arith.constant 0 : index
    %c256 = arith.constant 256 : index
    %2 = vector.load %arg1[%c0_2, %c256] : memref<16x1024xf32, #tpu.memory_space<vmem>>, vector<16x128xf32>
    %c0_3 = arith.constant 0 : index
    %c384 = arith.constant 384 : index
    %3 = vector.load %arg1[%c0_3, %c384] : memref<16x1024xf32, #tpu.memory_space<vmem>>, vector<16x128xf32>
    %c0_4 = arith.constant 0 : index
    %c512 = arith.constant 512 : index
    %4 = vector.load %arg1[%c0_4, %c512] : memref<16x1024xf32, #tpu.memory_space<vmem>>, vector<16x128xf32>
    %c0_5 = arith.constant 0 : index
    %c640 = arith.constant 640 : index
    %5 = vector.load %arg1[%c0_5, %c640] : memref<16x1024xf32, #tpu.memory_space<vmem>>, vector<16x128xf32>
    %c0_6 = arith.constant 0 : index
    %c768 = arith.constant 768 : index
    %6 = vector.load %arg1[%c0_6, %c768] : memref<16x1024xf32, #tpu.memory_space<vmem>>, vector<16x128xf32>
    %c0_7 = arith.constant 0 : index
    %c896 = arith.constant 896 : index
    %7 = vector.load %arg1[%c0_7, %c896] : memref<16x1024xf32, #tpu.memory_space<vmem>>, vector<16x128xf32>
    %8 = arith.addf %0, %1 : vector<16x128xf32>
    %9 = arith.addf %2, %3 : vector<16x128xf32>
    %10 = arith.addf %4, %5 : vector<16x128xf32>
    %11 = arith.addf %6, %7 : vector<16x128xf32>
    %12 = arith.addf %8, %9 : vector<16x128xf32>
    %13 = arith.addf %10, %11 : vector<16x128xf32>
    %14 = arith.addf %12, %13 : vector<16x128xf32>
    %cst = arith.constant 1.250000e-01 : f32
    %15 = vector.broadcast %cst : f32 to vector<16x128xf32>
    %16 = arith.mulf %14, %15 : vector<16x128xf32>
    %c0_8 = arith.constant 0 : index
    %c0_9 = arith.constant 0 : index
    %17 = vector.load %arg2[%c0_8, %c0_9] : memref<16x128xf32, #tpu.memory_space<vmem>>, vector<16x128xf32>
    tpu.vector_store %arg2[%c0_8, %c0_9], %16 {strides = array<i32>} : memref<16x128xf32, #tpu.memory_space<vmem>>, vector<16x128xf32>,
    return
  }
  func.func @transform_0(%arg0: i32) -> (i32, i32) {
    %c0_i32 = arith.constant 0 : i32
    %c0_i32_0 = arith.constant 0 : i32
    return %arg0, %c0_i32 : i32, i32
  }
  func.func @transform_1(%arg0: i32) -> (i32, i32) {
    %c0_i32 = arith.constant 0 : i32
    %c0_i32_0 = arith.constant 0 : i32
    return %arg0, %c0_i32 : i32, i32
  }
}

</mosaic_0001>

<bundles_post_ra>
// kernel: tpu_custom_call.1
= control target key start
LH: loop header
LB: loop body
LE: loop exit
PB: predicated region body
PF: predicated region fallthrough
CT: control target
= control target key end

     0   :  { %6 = vsyncpa [#allocation3], 0  ;;  %s168_s0 = inlined_call_operand.hbm [shape: f32[16,1024], index: 0, kind: input, shape index: {}]   ;;  %s169_s1 = inlined_call_operand.hbm [shape: f32[16,128], index: 1, kind: output, shape index: {}]  }
   0x1   :  { %7 = vsyncpa [#allocation4], 0  ;;  %s128_s6 = smov [#allocation2]   ;;  %s80_s10 = scalar_lea.hbm %s168_s0, 2048 }
   0x2   :  { %s13_s7 = sshll.u32 %s128_s6, 4  ;;  %p81_p0 = scmp.ne.s32.totalorder %s168_s0, %s80_s10  ;;  %s14_s7 = int_to_ptr.vmem [resolvable:$true] %s13_s7 }
   0x3   :  { %p84_p1 = scmp.lt.u32.totalorder %s80_s10, %s168_s0 }
   0x5   :  { %p86_p2 = pnand %p84_p1, %p81_p0 }
   0x7   :  { %89 = shalt.err (!%p86_p2)
}
   0x8   :  { %s90_s15 = scalar_lea.vmem %s14_s7, 2048  ;;  %p95_p4 = scmp.lt.s32.totalorder %s14_s7, %s14_s7 }
   0x9   :  { %p91_p3 = scmp.ne.s32.totalorder %s14_s7, %s90_s15  ;;  %p96_p5 = scmp.lt.s32.totalorder %s90_s15, %s90_s15 }
   0xb   :  { %p97_p6 = por %p96_p5, %p95_p4 }
   0xd   :  { %p98_p7 = pnand %p97_p6, %p91_p3 }
   0xf   :  { %101 = shalt.err (!%p98_p7)
}
  0x10   :  { %s129_s16 = smov 1024   ;;  %s130_s17 = smov 64  }
  0x11   :  { %19 = dma.hbm_to_vmem [thread:$0]  %s168_s0, 2048, %s14_s7, [#allocation3], %s129_s16, %s129_s16, %s130_s17  }
  0x12   :  { %124 = dma.done.wait [#allocation3], 2048  }
  0x13   :  { %125 = vsyncadd [#allocation3], 4294965248  ;;  %v23_v0 = vld [vmem:[#allocation2] sm:$0xff]  ;;  %v25_v1 = vld [vmem:[#allocation2 + $0x8] sm:$0xff]  ;;  %s131_s0 = smov [#allocation5]  }
  0x14   :  { %v27_v2 = vld [vmem:[#allocation2 + $0x10] sm:$0xff]  ;;  %v29_v3 = vld [vmem:[#allocation2 + $0x18] sm:$0xff]  ;;  %v31_v4 = vld [vmem:[#allocation2 + $0x20] sm:$0xff]  ;;  %v39_v6 = vadd.f32 %v25_v1, %v23_v0  ;;  %s62_s20 = sshll.u32 %s131_s0, 4  ;;  %s63_s20 = int_to_ptr.vmem [resolvable:$true] %s62_s20 }
  0x15   :  { %v33_v5 = vld [vmem:[#allocation2 + $0x28] sm:$0xff]  ;;  %v35_v7 = vld [vmem:[#allocation2 + $0x30] sm:$0xff]  ;;  %v37_v8 = vld [vmem:[#allocation2 + $0x38] sm:$0xff]  ;;  %v41_v9 = vadd.f32 %v29_v3, %v27_v2  ;;  %s102_s21 = scalar_lea.vmem %s63_s20, 256  ;;  %p107_p9 = scmp.lt.s32.totalorder %s63_s20, %s63_s20 }
  0x16   :  { %v43_v10 = vadd.f32 %v33_v5, %v31_v4  ;;  %v24_v11 = vld [vmem:[#allocation2 + $0x40] sm:$0xff]  ;;  %v45_v12 = vadd.f32 %v37_v8, %v35_v7  ;;  %v26_v13 = vld [vmem:[#allocation2 + $0x48] sm:$0xff]  ;;  %v28_v14 = vld [vmem:[#allocation2 + $0x50] sm:$0xff]  ;;  %p103_p8 = scmp.ne.s32.totalorder %s63_s20, %s102_s21  ;;  %p108_p10 = scmp.lt.s32.totalorder %s102_s21, %s102_s21 }
  0x17   :  { %v30_v15 = vld [vmem:[#allocation2 + $0x58] sm:$0xff]  ;;  %v47_v16 = vadd.f32 %v41_v9, %v39_v6  ;;  %v32_v17 = vld [vmem:[#allocation2 + $0x60] sm:$0xff]  ;;  %v34_v18 = vld [vmem:[#allocation2 + $0x68] sm:$0xff]  ;;  %v40_v20 = vadd.f32 %v26_v13, %v24_v11 }
  0x18   :  { %v36_v19 = vld [vmem:[#allocation2 + $0x70] sm:$0xff]  ;;  %v42_v21 = vadd.f32 %v30_v15, %v28_v14  ;;  %v49_v22 = vadd.f32 %v45_v12, %v43_v10  ;;  %v38_v23 = vld [vmem:[#allocation2 + $0x78] sm:$0xff]  ;;  %v44_v24 = vadd.f32 %v34_v18, %v32_v17  ;;  %p109_p11 = por %p108_p10, %p107_p9 }
  0x19   :  { %v46_v25 = vadd.f32 %v38_v23, %v36_v19 }
  0x1a   :  { %v48_v26 = vadd.f32 %v42_v21, %v40_v20  ;;  %v51_v27 = vadd.f32 %v49_v22, %v47_v16  ;;  %p110_p12 = pnand %p109_p11, %p103_p8 }
  0x1b   :  { %v50_v28 = vadd.f32 %v46_v25, %v44_v24 }
  0x1c   :  { %v53_v29 = vmul.f32 0.125, %v51_v27 }
  0x1d   :  { %v52_v30 = vadd.f32 %v50_v28, %v48_v26 }
  0x1e   :  { %55 = vst [vmem:[#allocation5] sm:$0xff] %v53_v29 }
  0x1f   :  { %v54_v31 = vmul.f32 0.125, %v52_v30 }
  0x21   :  { %56 = vst [vmem:[#allocation5 + $0x8] sm:$0xff] %v54_v31 }
  0x22   :  { %113 = shalt.err (!%p110_p12)
}
  0x23   :  { %s114_s24 = scalar_lea.hbm %s169_s1, 256 }
  0x24   :  { %p115_p13 = scmp.ne.s32.totalorder %s169_s1, %s114_s24  ;;  %p118_p0 = scmp.lt.u32.totalorder %s114_s24, %s169_s1 }
  0x26   :  { %p120_p1 = pnand %p118_p0, %p115_p13 }
  0x28   :  { %123 = shalt.err (!%p120_p1)
}
  0x29   :  { %s132_s29 = smov 128   ;;  %s133_s30 = smov 8  }
  0x2a   :  { %68 = dma.vmem_to_hbm [thread:$0]  %s63_s20, 256, %s169_s1, [#allocation4], %s132_s29, %s132_s29, %s133_s30  }
  0x2b   :  { %126 = dma.done.wait [#allocation4], 256  }
  0x2c   :  { %127 = vsyncadd [#allocation4], 4294967040 }
  0x2d   :  { %72 = vsyncpa [#allocation3], 1 }
  0x2e   :  { %73 = vsyncpa [#allocation4], 1 }

</bundles_post_ra>
